<compile_context>
chip_gen: v7x
topology: tpu7x:2x2x1
jax: 0.10.0
libtpu: 0.0.40
codegen_flags: <defaults>
</compile_context>

<pallas_src>
import functools

import jax
import jax.numpy as jnp
from jax.experimental import pallas as pl
from jax.experimental.pallas import tpu as pltpu


def _max_margin_kernel(x_ref, y_ref, dcol_ref, drow_ref, out_ref, acc_ref,
                       *, margin: float, inv_bb: float, diag_correction: float):
    i = pl.program_id(0)
    j = pl.program_id(1)

    @pl.when((i == 0) & (j == 0))
    def _init():
        acc_ref[0] = jnp.float32(0.0)

    # (TB, TB) score tile on the MXU; contraction dim chosen so no transpose
    # of y is materialized. Inputs stay in their native dtype, f32 accumulate.
    scores = jax.lax.dot_general(
        x_ref[...], y_ref[...],
        dimension_numbers=(((1,), (1,)), ((), ())),
        preferred_element_type=jnp.float32)

    base = scores + jnp.float32(margin)
    d1 = dcol_ref[...]                       # (TB, 1): diagonal.expand_as(scores)
    d2 = drow_ref[...]                       # (1, TB): diagonal.t().expand_as(scores)
    cost = jnp.maximum(base - d1, 0.0) + jnp.maximum(base - d2, 0.0)

    acc_ref[0] += jnp.sum(cost)

    @pl.when((i == pl.num_programs(0) - 1) & (j == pl.num_programs(1) - 1))
    def _finalize():
        # Remove the (unmasked) diagonal contribution and normalize by B*B.
        out_ref[0, 0] = (acc_ref[0] - jnp.float32(diag_correction)) * jnp.float32(inv_bb)


def _pick_block(b: int) -> int:
    for cand in (256, 128, 64, 32, 16, 8):
        if b % cand == 0:
            return cand
    return b


def max_margin_ranking_loss(x_embedding, y_embedding, margin: float = 0.2):
    """Pallas TPU implementation of MaxMarginRankingLoss.forward."""
    assert x_embedding.shape == y_embedding.shape
    B, D = x_embedding.shape

    tb = _pick_block(B)
    grid = (B // tb, B // tb)

    # Diagonal of x @ y.T as a rowwise dot: O(B*D), done once in f32 in the
    # wrapper and streamed to the kernel in both (B,1) and (1,B) layouts so no
    # in-kernel transpose / iota masking is needed.
    diag = jnp.sum(x_embedding.astype(jnp.float32) * y_embedding.astype(jnp.float32),
                   axis=1)
    diag_col = diag.reshape(B, 1)
    diag_row = diag.reshape(1, B)

    kernel = functools.partial(
        _max_margin_kernel,
        margin=float(margin),
        inv_bb=1.0 / float(B * B),
        diag_correction=2.0 * float(B) * max(float(margin), 0.0),
    )

    out = pl.pallas_call(
        kernel,
        out_shape=jax.ShapeDtypeStruct((1, 1), jnp.float32),
        grid=grid,
        in_specs=[
            pl.BlockSpec((tb, D), lambda i, j: (i, 0)),   # x rows for tile row i
            pl.BlockSpec((tb, D), lambda i, j: (j, 0)),   # y rows for tile col j
            pl.BlockSpec((tb, 1), lambda i, j: (i, 0)),   # diag as column (d1)
            pl.BlockSpec((1, tb), lambda i, j: (0, j)),   # diag as row    (d2)
        ],
        out_specs=pl.BlockSpec(memory_space=pltpu.SMEM),
        scratch_shapes=[pltpu.SMEM((1,), jnp.float32)],
        compiler_params=pltpu.CompilerParams(
            dimension_semantics=("arbitrary", "arbitrary")),
    )(x_embedding, y_embedding, diag_col, diag_row)
    return out[0, 0]


if __name__ == "__main__":
    key = jax.random.PRNGKey(0)
    kx, ky = jax.random.split(key)

    B, D = 8, 32
    x = jax.random.normal(kx, (B, D), dtype=jnp.float32)
    y = jax.random.normal(ky, (B, D), dtype=jnp.float32)

    margin = 0.2
    loss = jax.block_until_ready(max_margin_ranking_loss(x, y, margin=margin))

    # Pure-JAX reference (mirrors the torch forward exactly).
    scores = x @ y.T
    diag = jnp.diag(scores).reshape(B, 1)
    c1 = jnp.maximum(margin + scores - diag, 0.0)
    c2 = jnp.maximum(margin + scores - diag.T, 0.0)
    eye = jnp.eye(B, dtype=bool)
    c1 = jnp.where(eye, 0.0, c1)
    c2 = jnp.where(eye, 0.0, c2)
    ref = (c1.sum() + c2.sum()) / (B * B)

    assert jnp.allclose(loss, ref, rtol=1e-5, atol=1e-5), (loss, ref)
    print("KERNEL_OK")
</pallas_src>

<mosaic_0001>
module attributes {stable_mosaic.version = 11 : i64} {
  func.func @_max_margin_kernel(%arg0: i32, %arg1: i32, %arg2: memref<8x32xf32, #tpu.memory_space<vmem>>, %arg3: memref<8x32xf32, #tpu.memory_space<vmem>>, %arg4: memref<8x1xf32, #tpu.memory_space<vmem>>, %arg5: memref<1x8xf32, #tpu.memory_space<vmem>>, %arg6: memref<1x1xf32, #tpu.memory_space<smem>>, %arg7: memref<1xf32, #tpu.memory_space<smem>>) attributes {dimension_semantics = [#tpu.dimension_semantics<arbitrary>, #tpu.dimension_semantics<arbitrary>], iteration_bounds = array<i64: 1, 1>, scalar_prefetch = 0 : i64, scratch_operands = 1 : i64, tpu.core_type = #tpu.core_type<tc>, window_params = [{transform_indices = @transform_0, window_bounds = array<i64: 8, 32>}, {transform_indices = @transform_1, window_bounds = array<i64: 8, 32>}, {transform_indices = @transform_2, window_bounds = array<i64: 8, 1>}, {transform_indices = @transform_3, window_bounds = array<i64: 1, 8>}, {transform_indices = @transform_4, window_bounds = array<i64: 1, 1>}]} {
    %c0_i32 = arith.constant 0 : i32
    %0 = arith.cmpi eq, %arg0, %c0_i32 : i32
    %c0_i32_0 = arith.constant 0 : i32
    %1 = arith.cmpi eq, %arg1, %c0_i32_0 : i32
    %2 = arith.andi %0, %1 : i1
    %3 = arith.extui %2 : i1 to i32
    %c0_i32_1 = arith.constant 0 : i32
    %4 = arith.cmpi ne, %3, %c0_i32_1 : i32
    scf.if %4 {
      %cst_18 = arith.constant 0.000000e+00 : f32
      %c0_19 = arith.constant 0 : index
      %33 = memref.load %arg7[%c0_19] : memref<1xf32, #tpu.memory_space<smem>>
      memref.store %cst_18, %arg7[%c0_19] : memref<1xf32, #tpu.memory_space<smem>>
    } else {
    }
    %c0 = arith.constant 0 : index
    %c0_2 = arith.constant 0 : index
    %5 = vector.load %arg2[%c0, %c0_2] : memref<8x32xf32, #tpu.memory_space<vmem>>, vector<8x32xf32>
    %c0_3 = arith.constant 0 : index
    %c0_4 = arith.constant 0 : index
    %6 = vector.load %arg3[%c0_3, %c0_4] : memref<8x32xf32, #tpu.memory_space<vmem>>, vector<8x32xf32>
    %cst = arith.constant dense<0.000000e+00> : vector<8x8xf32>
    %7 = tpu.matmul %5, %6, %cst {dimension_numbers = #tpu.dot_dimension_numbers<[1], [1], [0], [0], [0, 0, 1, 0], [], []>} : vector<8x32xf32>, vector<8x32xf32>, vector<8x8xf32> -> vector<8x8xf32>
    %cst_5 = arith.constant 2.000000e-01 : f32
    %8 = vector.broadcast %cst_5 : f32 to vector<8x8xf32>
    %9 = arith.addf %7, %8 : vector<8x8xf32>
    %c0_6 = arith.constant 0 : index
    %c0_7 = arith.constant 0 : index
    %10 = vector.load %arg4[%c0_6, %c0_7] : memref<8x1xf32, #tpu.memory_space<vmem>>, vector<8x1xf32>
    %c0_8 = arith.constant 0 : index
    %c0_9 = arith.constant 0 : index
    %11 = vector.load %arg5[%c0_8, %c0_9] : memref<1x8xf32, #tpu.memory_space<vmem>>, vector<1x8xf32>
    %12 = vector.broadcast %10 : vector<8x1xf32> to vector<8x8xf32>
    %13 = arith.subf %9, %12 : vector<8x8xf32>
    %cst_10 = arith.constant 0.000000e+00 : f32
    %14 = vector.broadcast %cst_10 : f32 to vector<8x8xf32>
    %15 = arith.maximumf %13, %14 : vector<8x8xf32>
    %16 = vector.broadcast %11 : vector<1x8xf32> to vector<8x8xf32>
    %17 = arith.subf %9, %16 : vector<8x8xf32>
    %cst_11 = arith.constant 0.000000e+00 : f32
    %18 = vector.broadcast %cst_11 : f32 to vector<8x8xf32>
    %19 = arith.maximumf %17, %18 : vector<8x8xf32>
    %20 = arith.addf %15, %19 : vector<8x8xf32>
    %c0_12 = arith.constant 0 : index
    %21 = memref.load %arg7[%c0_12] : memref<1xf32, #tpu.memory_space<smem>>
    %22 = vector.shape_cast %20 : vector<8x8xf32> to vector<1x8x8xf32>
    %cst_13 = arith.constant dense<0.000000e+00> : vector<1xf32>
    %23 = vector.multi_reduction <add>, %22, %cst_13 [1, 2] : vector<1x8x8xf32> to vector<1xf32>
    %24 = vector.shape_cast %23 : vector<1xf32> to vector<1x1x1xf32>
    %25 = vector.extract %24[0, 0, 0] : f32 from vector<1x1x1xf32>
    %26 = arith.addf %21, %25 : f32
    %c0_14 = arith.constant 0 : index
    %27 = memref.load %arg7[%c0_14] : memref<1xf32, #tpu.memory_space<smem>>
    memref.store %26, %arg7[%c0_14] : memref<1xf32, #tpu.memory_space<smem>>
    %c0_i32_15 = arith.constant 0 : i32
    %28 = arith.cmpi eq, %arg0, %c0_i32_15 : i32
    %c0_i32_16 = arith.constant 0 : i32
    %29 = arith.cmpi eq, %arg1, %c0_i32_16 : i32
    %30 = arith.andi %28, %29 : i1
    %31 = arith.extui %30 : i1 to i32
    %c0_i32_17 = arith.constant 0 : i32
    %32 = arith.cmpi ne, %31, %c0_i32_17 : i32
    scf.if %32 {
      %c0_18 = arith.constant 0 : index
      %33 = memref.load %arg7[%c0_18] : memref<1xf32, #tpu.memory_space<smem>>
      %cst_19 = arith.constant 3.200000e+00 : f32
      %34 = arith.subf %33, %cst_19 : f32
      %cst_20 = arith.constant 1.562500e-02 : f32
      %35 = arith.mulf %34, %cst_20 : f32
      %c0_21 = arith.constant 0 : index
      %c0_22 = arith.constant 0 : index
      %36 = memref.load %arg6[%c0_21, %c0_22] : memref<1x1xf32, #tpu.memory_space<smem>>
      memref.store %35, %arg6[%c0_21, %c0_22] : memref<1x1xf32, #tpu.memory_space<smem>>
    } else {
    }
    return
  }
  func.func @transform_0(%arg0: i32, %arg1: i32) -> (i32, i32) {
    %c0_i32 = arith.constant 0 : i32
    %c0_i32_0 = arith.constant 0 : i32
    return %arg0, %c0_i32 : i32, i32
  }
  func.func @transform_1(%arg0: i32, %arg1: i32) -> (i32, i32) {
    %c0_i32 = arith.constant 0 : i32
    %c0_i32_0 = arith.constant 0 : i32
    return %arg1, %c0_i32 : i32, i32
  }
  func.func @transform_2(%arg0: i32, %arg1: i32) -> (i32, i32) {
    %c0_i32 = arith.constant 0 : i32
    %c0_i32_0 = arith.constant 0 : i32
    return %arg0, %c0_i32 : i32, i32
  }
  func.func @transform_3(%arg0: i32, %arg1: i32) -> (i32, i32) {
    %c0_i32 = arith.constant 0 : i32
    %c0_i32_0 = arith.constant 0 : i32
    return %c0_i32, %arg1 : i32, i32
  }
  func.func @transform_4(%arg0: i32, %arg1: i32) -> (i32, i32) {
    %c0_i32 = arith.constant 0 : i32
    %c0_i32_0 = arith.constant 0 : i32
    %c0_i32_1 = arith.constant 0 : i32
    return %c0_i32, %c0_i32_0 : i32, i32
  }
}

</mosaic_0001>

<bundles_post_ra>
// kernel: tpu_custom_call.1
= control target key start
LH: loop header
LB: loop body
LE: loop exit
PB: predicated region body
PF: predicated region fallthrough
CT: control target
= control target key end

     0   :  { %9 = vsyncpa [#allocation4], 0  ;;  %s289_s0 = inlined_call_operand.vmem [shape: f32[8,32], index: 0, kind: input, shape index: {}]   ;;  %s290_s1 = inlined_call_operand.hbm [shape: f32[8,32], index: 1, kind: input, shape index: {}]   ;;  %s291_s2 = inlined_call_operand.vmem [shape: f32[8,1], index: 2, kind: input, shape index: {}]   ;;  %s292_s3 = inlined_call_operand.vmem [shape: f32[1,8], index: 3, kind: input, shape index: {}]   ;;  %s293_s4 = inlined_call_operand.hbm [shape: f32[1,1], index: 4, kind: output, shape index: {}]  }
   0x1   :  { %10 = vsyncpa [#allocation5], 0  ;;  %s226_s15 = smov [#allocation3]   ;;  %s190_s19 = scalar_lea.hbm %s290_s1, 128 }
   0x2   :  { %s19_s16 = sshll.u32 %s226_s15, 4  ;;  %p191_p0 = scmp.ne.s32.totalorder %s290_s1, %s190_s19  ;;  %s20_s16 = int_to_ptr.vmem [resolvable:$true] %s19_s16 }
   0x3   :  { %p194_p1 = scmp.lt.u32.totalorder %s190_s19, %s290_s1 }
   0x5   :  { %p196_p2 = pnand %p194_p1, %p191_p0 }
   0x7   :  { %199 = shalt.err (!%p196_p2)
}
   0x8   :  { %s200_s24 = scalar_lea.vmem %s20_s16, 128  ;;  %p205_p4 = scmp.lt.s32.totalorder %s20_s16, %s20_s16 }
   0x9   :  { %p201_p3 = scmp.ne.s32.totalorder %s20_s16, %s200_s24  ;;  %p206_p5 = scmp.lt.s32.totalorder %s200_s24, %s200_s24 }
   0xb   :  { %p207_p6 = por %p206_p5, %p205_p4 }
   0xd   :  { %p208_p7 = pnand %p207_p6, %p201_p3 }
   0xf   :  { %211 = shalt.err (!%p208_p7)
}
  0x10   :  { %22 = dma.hbm_to_vmem [thread:$0]  %s290_s1, 128, %s20_s16, [#allocation4]  }
  0x11   :  { %222 = dma.done.wait [#allocation4], 128  }
  0x12   :  { %223 = vsyncadd [#allocation4], 4294967168  ;;  %v227_v0 = vmov 0.0   ;;  %vm228_vm0 = vmmov 0   ;;  %v229_v1 = vmov 0   ;;  %vm40_vm1 = vcmask 261120  }
  0x13   :  { %177 = vmatprep.subr.mxu0 %v227_v0  ;;  %179 = vmatprep.mubr.msk.f32.mxu0 %vm228_vm0, %v227_v0  ;;  %v39_v2 = vld [vmem:[#allocation3] sm:$0xff]  ;;  %vm136_vm2 = vcmask 64512   ;;  %s212_s8 = scalar_lea.hbm %s293_s4, 16 }
  0x14   :  { %189 = vset.pattern.permute.xlu0 %v229_v1  ;;  %v117_v3 = vld [vmem:[%s291_s2] sm:$0xff]  ;;  %178 = vmatpush3.xpose.msk.msra.mxu0 %vm40_vm1, %v39_v2  ;;  %p213_p8 = scmp.ne.s32.totalorder %s293_s4, %s212_s8  ;;  %p216_p9 = scmp.lt.u32.totalorder %s212_s8, %s293_s4 }
  0x15   :  { %v38_v4 = vld [vmem:[%s289_s0] sm:$0xff]  ;;  %121 = vperm.xlu0 %189, %v117_v3  }
  0x16   :  { %v173_v6 = vld [vmem:[%s292_s3] ss:$0 sm:$0xff]  ;;  %p218_p10 = pnand %p216_p9, %p213_p8 }
  0x17   :  { %180 = vmatmul.mubr.msk.f32.vlgmr.msra.gmra.mrb[0].mxu0 %vm40_vm1, %v38_v4 }
  0x94   :  { %v122_v7 = vpop.permute.xlu0 %121 }
  0xea   :  { %v113_v5 = vpop.f32.mrb[0].mxu0 }
  0xeb   :  { %v114_v8 = vadd.f32 0.2, %v113_v5  ;;  %v181_v9 = vpop.f32.mrb[1].mxu0 }
  0xed   :  { %v132_v10 = vsub.f32 %v114_v8, %v173_v6  ;;  %v124_v11 = vsub.f32 %v114_v8, %v122_v7 }
  0xef   :  { %v133_v12 = vmax.f32 %v132_v10, 0.0  ;;  %v125_v13 = vmax.f32 %v124_v11, 0.0 }
  0xf1   :  { %v134_v14 = vadd.f32 %v133_v12, %v125_v13 }
  0xf3   :  { %v137_v15 = vsel %vm136_vm2, %v134_v14, 0.0 }
  0xf4   :  { %138 = vadd.xlane.f32.xlu0 %v137_v15 }
 0x181   :  { %v139_v16 = vpop.xlane.xlu0 %138 }
 0x182   :  { %v140_v17 = vrot.slane %v139_v16, 4 }
 0x184   :  { %v141_v18 = vadd.f32 %v140_v17, %v139_v16 }
 0x186   :  { %v142_v19 = vrot.slane %v141_v18, 2 }
 0x188   :  { %v143_v20 = vadd.f32 %v142_v19, %v141_v18 }
 0x18a   :  { %v144_v21 = vrot.slane %v143_v20, 1 }
 0x18c   :  { %v145_v22 = vadd.f32 %v144_v21, %v143_v20 }
 0x18e   :  { %182 = vpush %v145_v22 }
 0x1bf   :  { %s183_s0 = spop %182 }
 0x1c0   :  { %s174_s2 = sadd.f32 -3.2, %s183_s0 }
 0x1c2   :  { %s154_s3 = smul.f32 0.015625, %s174_s2 }
 0x1c4   :  { %156 = sst [smem:[#allocation6]] %s154_s3 }
 0x1c5   :  { %221 = shalt.err (!%p218_p10)
}
 0x1c6   :  { %s230_s13 = smov [#allocation6]  }
 0x1c7   :  { %164 = dma.smem_to_hbm %s230_s13, 16, %s293_s4, [#allocation5]  }
 0x1c8   :  { %224 = dma.done.wait [#allocation5], 16  }
 0x1c9   :  { %225 = vsyncadd [#allocation5], 4294967280 }
 0x1ca   :  { %168 = sfence }
 0x1cb   :  { %169 = vsyncpa [#allocation4], 1 }
 0x1cc   :  { %170 = vsyncpa [#allocation5], 1 }

</bundles_post_ra>
